<compile_context>
chip_gen: v6e
topology: v6e:2x2x1
jax: 0.10.0
libtpu: 0.0.40
codegen_flags: <defaults>
</compile_context>

<pallas_src>
import functools
import math

import jax
import jax.numpy as jnp
from jax.experimental import pallas as pl
from jax.experimental.pallas import tpu as pltpu


def _sigmoid(x):
    # EUP-friendly: sigmoid(x) = 0.5 * (tanh(x/2) + 1)
    return 0.5 * (jnp.tanh(0.5 * x) + 1.0)


def _radix_softmax_kernel(x_ref, o_ref, *, radix, cardinality, r, k, total):
    """Block: (TB, k*total); each lane row holds k original batch rows.

    Per packed row p, input channel layout:  (cardinality, radix, r)
    Per packed row p, output channel layout: (radix, cardinality, r)
    Softmax runs over the radix groups; slabs are gathered with static Ref
    slices and the whole reordered row is written with ONE full-width store.
    """
    out_slabs = []
    for p in range(k):
        base = p * total
        per_rd = [[None] * cardinality for _ in range(radix)]
        for c in range(cardinality):
            def slab(rd, _base=base, _c=c):
                start = _base + (_c * radix + rd) * r
                return x_ref[:, start:start + r].astype(jnp.float32)

            if radix == 2:
                # softmax over 2 elements == [sigmoid(a-b), sigmoid(b-a)]
                pa = _sigmoid(slab(0) - slab(1))
                per_rd[0][c] = pa
                per_rd[1][c] = 1.0 - pa
            else:
                parts = [slab(rd) for rd in range(radix)]
                m = parts[0]
                for q in parts[1:]:
                    m = jnp.maximum(m, q)
                es = [jnp.exp(q - m) for q in parts]
                s = es[0]
                for e in es[1:]:
                    s = s + e
                inv = 1.0 / s  # exact: keep probabilities normalized
                for rd in range(radix):
                    per_rd[rd][c] = es[rd] * inv
        for rd in range(radix):
            for c in range(cardinality):
                out_slabs.append(per_rd[rd][c].astype(o_ref.dtype))
    # Single lane-dense, unmasked store of the whole block.
    o_ref[...] = jnp.concatenate(out_slabs, axis=-1)


def _sigmoid_kernel(x_ref, o_ref):
    # Elementwise; compute in the input dtype (bf16 stays bf16 on v6e/v7x).
    x = x_ref[...]
    o_ref[...] = _sigmoid(x).astype(o_ref.dtype)


def _sublane_multiple(dtype):
    itemsize = jnp.dtype(dtype).itemsize
    return max(8, 32 // itemsize)  # 8 for f32, 16 for bf16, 32 for int8/fp8


def _choose_batch_tile(rows, width, dtype):
    """Pick a row tile so the op runs in 1-2 grid steps, each buffered block
    stays ~1 MiB (safe for v5e's 16 MiB scoped VMEM and v7x's 64 MiB part),
    and the (8,128) block rule holds (tile multiple of the sublane packing,
    or the full row count)."""
    sub = _sublane_multiple(dtype)
    itemsize = jnp.dtype(dtype).itemsize
    budget = 1 * 1024 * 1024  # bytes per buffered block
    if rows <= 2 * sub:
        return rows  # single block, grid=(1,)
    # >= 2 parallel blocks so both v7x TensorCores get work.
    tb = sub * pl.cdiv(pl.cdiv(rows, 2), sub)
    while tb > sub and tb * width * itemsize > budget:
        tb = max(sub, ((tb // 2) + sub - 1) // sub * sub)
    return tb


def radix_softmax(x, radix, cardinality):
    """x: NCHW array (B, C, H, W). Matches RadixSoftmax.forward."""
    batch = x.shape[0]
    total = math.prod(x.shape[1:])
    xf = x.reshape(batch, total)  # channels already contiguous: free reshape
    cparams = pltpu.CompilerParams(dimension_semantics=("parallel",))

    if radix > 1:
        assert total % (cardinality * radix) == 0
        r = total // (cardinality * radix)

        # Pack k batch rows per lane row when the channel dim is narrow so the
        # HBM block / writeback is lane-dense (width >= 128 where possible).
        k = 1
        if total < 128:
            k = max(1, 128 // total)
            while k > 1 and batch % k != 0:
                k -= 1
        rows = batch // k
        width = k * total
        xp = xf.reshape(rows, width)

        tb = _choose_batch_tile(rows, width, x.dtype)
        grid = (pl.cdiv(rows, tb),)
        kernel = functools.partial(
            _radix_softmax_kernel,
            radix=radix, cardinality=cardinality, r=r, k=k, total=total,
        )
        out = pl.pallas_call(
            kernel,
            out_shape=jax.ShapeDtypeStruct((rows, width), x.dtype),
            grid_spec=pltpu.PrefetchScalarGridSpec(
                num_scalar_prefetch=0,
                grid=grid,
                in_specs=[pl.BlockSpec((tb, width), lambda b: (b, 0))],
                out_specs=pl.BlockSpec((tb, width), lambda b: (b, 0)),
            ),
            compiler_params=cparams,
        )(xp)
        # Rows were packed contiguously, so this reshape recovers (B, C);
        # channels are already in radix-major (radix, cardinality, r) order.
        return out.reshape(batch, total)
    else:
        tb = _choose_batch_tile(batch, total, x.dtype)
        grid = (pl.cdiv(batch, tb),)
        out = pl.pallas_call(
            _sigmoid_kernel,
            out_shape=jax.ShapeDtypeStruct((batch, total), x.dtype),
            grid_spec=pltpu.PrefetchScalarGridSpec(
                num_scalar_prefetch=0,
                grid=grid,
                in_specs=[pl.BlockSpec((tb, total), lambda b: (b, 0))],
                out_specs=pl.BlockSpec((tb, total), lambda b: (b, 0)),
            ),
            compiler_params=cparams,
        )(xf)
        return out.reshape(x.shape)  # sigmoid keeps the original NCHW shape


def _reference(x, radix, cardinality):
    batch = x.shape[0]
    total = math.prod(x.shape[1:])
    if radix > 1:
        r = total // (cardinality * radix)
        xr = x.reshape(batch, cardinality, radix, r).transpose(0, 2, 1, 3)
        xr = jax.nn.softmax(xr.astype(jnp.float32), axis=1).astype(x.dtype)
        return xr.reshape(batch, -1)
    else:
        return jax.nn.sigmoid(x.astype(jnp.float32)).astype(x.dtype)


if __name__ == "__main__":
    key = jax.random.PRNGKey(0)

    # ---- radix > 1, typical ResNeSt config: radix=2, cardinality=1 ----
    radix, cardinality, rchannels = 2, 1, 32
    B = 2
    C = radix * cardinality * rchannels  # 64
    x = jax.random.normal(key, (B, C, 1, 1), dtype=jnp.float32)  # NCHW attention tensor
    out = jax.block_until_ready(radix_softmax(x, radix, cardinality))
    ref = _reference(x, radix, cardinality)
    assert out.shape == (B, C), out.shape
    assert jnp.allclose(out, ref, atol=1e-5, rtol=1e-5), "radix=2 mismatch"

    # ---- general radix > 2 path (exact normalization) ----
    k3 = jax.random.PRNGKey(2)
    radix4, card4, r4 = 4, 2, 16
    C4 = radix4 * card4 * r4  # 128
    x4 = jax.random.normal(k3, (B, C4, 1, 1), dtype=jnp.float32)
    out4 = jax.block_until_ready(radix_softmax(x4, radix4, card4))
    ref4 = _reference(x4, radix4, card4)
    assert out4.shape == (B, C4), out4.shape
    assert jnp.allclose(out4, ref4, atol=1e-5, rtol=1e-5), "radix=4 mismatch"

    # ---- radix == 1 path (sigmoid) ----
    k2 = jax.random.PRNGKey(1)
    x1 = jax.random.normal(k2, (B, 32, 1, 1), dtype=jnp.float32)
    out1 = jax.block_until_ready(radix_softmax(x1, radix=1, cardinality=1))
    ref1 = _reference(x1, 1, 1)
    assert out1.shape == x1.shape, out1.shape
    assert jnp.allclose(out1, ref1, atol=1e-5, rtol=1e-5), "radix==1 mismatch"

    print("KERNEL_OK")
</pallas_src>

<mosaic_0001>
module attributes {stable_mosaic.version = 11 : i64} {
  func.func @_radix_softmax_kernel(%arg0: i32, %arg1: memref<1x128xf32, #tpu.memory_space<vmem>>, %arg2: memref<1x128xf32, #tpu.memory_space<vmem>>) attributes {dimension_semantics = [#tpu.dimension_semantics<parallel>], iteration_bounds = array<i64: 1>, scalar_prefetch = 0 : i64, scratch_operands = 0 : i64, tpu.core_type = #tpu.core_type<tc>, window_params = [{transform_indices = @transform_0, window_bounds = array<i64: 1, 128>}, {transform_indices = @transform_1, window_bounds = array<i64: 1, 128>}]} {
    %c0 = arith.constant 0 : index
    %c0_0 = arith.constant 0 : index
    %0 = vector.load %arg1[%c0, %c0_0] : memref<1x128xf32, #tpu.memory_space<vmem>>, vector<1x32xf32>
    %c0_1 = arith.constant 0 : index
    %c32 = arith.constant 32 : index
    %1 = vector.load %arg1[%c0_1, %c32] : memref<1x128xf32, #tpu.memory_space<vmem>>, vector<1x32xf32>
    %2 = arith.subf %0, %1 : vector<1x32xf32>
    %cst = arith.constant 5.000000e-01 : f32
    %3 = vector.broadcast %cst : f32 to vector<1x32xf32>
    %4 = arith.mulf %3, %2 : vector<1x32xf32>
    %5 = math.tanh %4 : vector<1x32xf32>
    %cst_2 = arith.constant 1.000000e+00 : f32
    %6 = vector.broadcast %cst_2 : f32 to vector<1x32xf32>
    %7 = arith.addf %5, %6 : vector<1x32xf32>
    %cst_3 = arith.constant 5.000000e-01 : f32
    %8 = vector.broadcast %cst_3 : f32 to vector<1x32xf32>
    %9 = arith.mulf %8, %7 : vector<1x32xf32>
    %cst_4 = arith.constant 1.000000e+00 : f32
    %10 = vector.broadcast %cst_4 : f32 to vector<1x32xf32>
    %11 = arith.subf %10, %9 : vector<1x32xf32>
    %c0_5 = arith.constant 0 : index
    %c64 = arith.constant 64 : index
    %12 = vector.load %arg1[%c0_5, %c64] : memref<1x128xf32, #tpu.memory_space<vmem>>, vector<1x32xf32>
    %c0_6 = arith.constant 0 : index
    %c96 = arith.constant 96 : index
    %13 = vector.load %arg1[%c0_6, %c96] : memref<1x128xf32, #tpu.memory_space<vmem>>, vector<1x32xf32>
    %14 = arith.subf %12, %13 : vector<1x32xf32>
    %cst_7 = arith.constant 5.000000e-01 : f32
    %15 = vector.broadcast %cst_7 : f32 to vector<1x32xf32>
    %16 = arith.mulf %15, %14 : vector<1x32xf32>
    %17 = math.tanh %16 : vector<1x32xf32>
    %cst_8 = arith.constant 1.000000e+00 : f32
    %18 = vector.broadcast %cst_8 : f32 to vector<1x32xf32>
    %19 = arith.addf %17, %18 : vector<1x32xf32>
    %cst_9 = arith.constant 5.000000e-01 : f32
    %20 = vector.broadcast %cst_9 : f32 to vector<1x32xf32>
    %21 = arith.mulf %20, %19 : vector<1x32xf32>
    %cst_10 = arith.constant 1.000000e+00 : f32
    %22 = vector.broadcast %cst_10 : f32 to vector<1x32xf32>
    %23 = arith.subf %22, %21 : vector<1x32xf32>
    %24 = tpu.concatenate %9, %11, %21, %23 in 1 : vector<1x32xf32>, vector<1x32xf32>, vector<1x32xf32>, vector<1x32xf32> -> vector<1x128xf32>
    %c0_11 = arith.constant 0 : index
    %c0_12 = arith.constant 0 : index
    %25 = vector.load %arg2[%c0_11, %c0_12] : memref<1x128xf32, #tpu.memory_space<vmem>>, vector<1x128xf32>
    tpu.vector_store %arg2[%c0_11, %c0_12], %24 {strides = array<i32>} : memref<1x128xf32, #tpu.memory_space<vmem>>, vector<1x128xf32>,
    return
  }
  func.func @transform_0(%arg0: i32) -> (i32, i32) {
    %c0_i32 = arith.constant 0 : i32
    %c0_i32_0 = arith.constant 0 : i32
    return %arg0, %c0_i32 : i32, i32
  }
  func.func @transform_1(%arg0: i32) -> (i32, i32) {
    %c0_i32 = arith.constant 0 : i32
    %c0_i32_0 = arith.constant 0 : i32
    return %arg0, %c0_i32 : i32, i32
  }
}

</mosaic_0001>

<bundles_post_ra>
// kernel: tpu_custom_call.1
= control target key start
LH: loop header
LB: loop body
LE: loop exit
PB: predicated region body
PF: predicated region fallthrough
CT: control target
= control target key end

     0   :  { %6 = vsyncpa [#allocation3], 0  ;;  %s132_s0 = inlined_call_operand.hbm [shape: f32[1,128], index: 0, kind: input, shape index: {}]   ;;  %s133_s1 = inlined_call_operand.hbm [shape: f32[1,128], index: 1, kind: output, shape index: {}]  }
   0x1   :  { %7 = vsyncpa [#allocation4], 0  ;;  %s112_s6 = smov [#allocation2]  }
   0x2   :  { %s14_s7 = sshll.u32 %s112_s6, 4  ;;  %s15_s7 = int_to_ptr.vmem [resolvable:$true] %s14_s7 }
   0x3   :  { %s76_s8 = scalar_lea.vmem %s15_s7, 16  ;;  %s80_s9 = scalar_lea.vmem %s15_s7, 32 }
   0x4   :  { %p77_p0 = scmp.ne.s32.totalorder %s15_s7, %s76_s8  ;;  %p81_p1 = scmp.lt.s32.totalorder %s15_s7, %s15_s7 }
   0x5   :  { %p82_p2 = scmp.lt.s32.totalorder %s80_s9, %s76_s8 }
   0x7   :  { %p83_p3 = por %p82_p2, %p81_p1 }
   0x9   :  { %p84_p4 = pnand %p83_p3, %p77_p0 }
   0xb   :  { %87 = shalt.err (!%p84_p4)
}
   0xc   :  { %17 = dma.hbm_to_vmem [thread:$0]  %s132_s0, 16, %s15_s7, [#allocation3]  }
   0xd   :  { %108 = dma.done.wait [#allocation3], 16  }
   0xe   :  { %109 = vsyncadd [#allocation3], 4294967280  ;;  %v21_v0 = vld [vmem:[#allocation2] sm:$0x1]  ;;  %s113_s12 = smov 96   ;;  %v33_v4 = vlaneseq  ;;  %s114_s13 = smov 32  }
   0xf   :  { %23 = vrot.lane.b32.xlu0 %v21_v0, %s113_s12  ;;  %vm40_vm0 = vcmask 261120   ;;  %vm42_vm1 = vcmask 523264   ;;  %s115_s0 = smov [#allocation5]   ;;  %vm44_vm2 = vcmask 785408  }
  0x10   :  { %v34_v5 = vshrl.u32 %v33_v4, 7  ;;  %s53_s14 = sshll.u32 %s115_s0, 4  ;;  %s54_s14 = int_to_ptr.vmem [resolvable:$true] %s53_s14 }
  0x11   :  { %s88_s15 = scalar_lea.vmem %s54_s14, 16  ;;  %s92_s16 = scalar_lea.vmem %s54_s14, 32 }
  0x12   :  { %v35_v9 = vsub.s32 0, %v34_v5  ;;  %p89_p5 = scmp.ne.s32.totalorder %s54_s14, %s88_s15  ;;  %p93_p6 = scmp.lt.s32.totalorder %s54_s14, %s54_s14 }
  0x13   :  { %p94_p7 = scmp.lt.s32.totalorder %s92_s16, %s88_s15 }
  0x15   :  { %p95_p8 = por %p94_p7, %p93_p6 }
  0x17   :  { %p96_p9 = pnand %p95_p8, %p89_p5 }
  0x81   :  { %v24_v1 = vpop.permute.xlu0 %23 }
  0x82   :  { %v26_v2 = vsub.f32 %v21_v0, %v24_v1 }
  0x84   :  { %v27_v3 = vmul.f32 0.5, %v26_v2 }
  0x86   :  { %66 = vtanh.f32 %v27_v3 }
  0x93   :  { %v67_v6 = vpop.eup %66 }
  0x94   :  { %v29_v7 = vadd.f32 1.0, %v67_v6 }
  0x96   :  { %v30_v8 = vmul.f32 0.5, %v29_v7 }
  0x98   :  { %v31_v10 = vsub.f32 1.0, %v30_v8 }
  0x9a   :  { %v36_v11 = vrot.slane %v31_v10, %v35_v9 }
  0x9c   :  { %37 = vrot.lane.b32.xlu0 %v36_v11, %s114_s13 }
 0x10e   :  { %v38_v12 = vpop.permute.xlu0 %37 }
 0x10f   :  { %v41_v13 = vsel %vm40_vm0, %v30_v8, %v38_v12 }
 0x110   :  { %v43_v14 = vsel %vm42_vm1, %v41_v13, %v30_v8 }
 0x111   :  { %v45_v15 = vsel %vm44_vm2, %v43_v14, %v38_v12 }
 0x112   :  { %46 = vst [vmem:[#allocation5] sm:$0x1] %v45_v15 }
 0x113   :  { %99 = shalt.err (!%p96_p9)
}
 0x114   :  { %56 = dma.vmem_to_hbm [thread:$0]  %s54_s14, 16, %s133_s1, [#allocation4]  }
 0x115   :  { %110 = dma.done.wait [#allocation4], 16  }
 0x116   :  { %111 = vsyncadd [#allocation4], 4294967280 }
 0x117   :  { %60 = vsyncpa [#allocation3], 1 }
 0x118   :  { %61 = vsyncpa [#allocation4], 1 }

</bundles_post_ra>
